<compile_context>
chip_gen: v7x
topology: tpu7x:2x2x1
jax: 0.10.0
libtpu: 0.0.40
codegen_flags: <defaults>
</compile_context>

<pallas_src>
import jax
import jax.numpy as jnp
from jax import lax
from jax.experimental import pallas as pl
from jax.experimental.pallas import tpu as pltpu

MLP_SCALE = 4
LN_EPS = 1e-5                       # torch.nn.LayerNorm default
_SQRT_2_OVER_PI = 0.7978845608028654


def _round_up(n, m):
    return ((n + m - 1) // m) * m


def _select_budget():
    """Per-generation (vmem_limit_bytes, default row tile)."""
    try:
        cap = getattr(pltpu.get_tpu_info(), "vmem_capacity_bytes", None)
    except Exception:
        cap = None
    if cap is not None and cap >= (96 << 20):
        return 100 << 20, 512       # v5e / v6e: 128 MiB physical VMEM
    return 48 << 20, 256            # v7x (64 MiB per TC) or unknown: stay safe


def _mlp_concat_kernel(x_ref, attn_ref, gamma_ref, beta_ref,
                       w1x_ref, w1a_ref, b1_ref, w2_ref, out_ref):
    # ---- LayerNorm over the feature axis (f32, elementwise affine) ----
    x = x_ref[...]
    mean = jnp.mean(x, axis=-1, keepdims=True)
    xc = x - mean
    var = jnp.mean(xc * xc, axis=-1, keepdims=True)
    xn = (xc * lax.rsqrt(var + LN_EPS)) * gamma_ref[...] + beta_ref[...]

    # ---- c_fc: concat(xn, attn) @ W1 + b1 without materializing the concat.
    #      bf16 operands on the MXU, f32 accumulation.
    xn_bf = xn.astype(jnp.bfloat16)
    at_bf = attn_ref[...].astype(jnp.bfloat16)
    h = (jnp.dot(xn_bf, w1x_ref[...], preferred_element_type=jnp.float32)
         + jnp.dot(at_bf, w1a_ref[...], preferred_element_type=jnp.float32)
         + b1_ref[...])

    # ---- GELU(approximate='tanh'), f32 ----
    g = 0.5 * h * (1.0 + jnp.tanh(_SQRT_2_OVER_PI * h * (1.0 + 0.044715 * h * h)))

    # ---- c_proj (no bias), bf16 MXU / f32 accumulate ----
    out_ref[...] = jnp.dot(g.astype(jnp.bfloat16), w2_ref[...],
                           preferred_element_type=jnp.float32).astype(out_ref.dtype)


def _build_call(tm, n_embd, hidden, rows, n_tiles, vmem_limit, cost,
                single_buffer_weights):
    row_spec = pl.BlockSpec((tm, n_embd), lambda i: (i, 0))      # pipelined rows
    if single_buffer_weights:
        resident = lambda shape: pl.BlockSpec(
            shape, lambda i: (0, 0), pipeline_mode=pl.Buffered(1))
    else:                                    # fallback: default double buffering
        resident = lambda shape: pl.BlockSpec(shape, lambda i: (0, 0))

    return pl.pallas_call(
        _mlp_concat_kernel,
        out_shape=jax.ShapeDtypeStruct((rows, n_embd), jnp.float32),
        grid_spec=pltpu.PrefetchScalarGridSpec(
            num_scalar_prefetch=0,
            grid=(n_tiles,),
            in_specs=[
                row_spec,                      # x rows (f32)
                row_spec,                      # attn rows (f32)
                resident((1, n_embd)),         # ln gamma
                resident((1, n_embd)),         # ln beta
                resident((n_embd, hidden)),    # W1 (x half), bf16
                resident((n_embd, hidden)),    # W1 (attn half), bf16
                resident((1, hidden)),         # b1
                resident((hidden, n_embd)),    # W2, bf16
            ],
            out_specs=row_spec,
        ),
        compiler_params=pltpu.CompilerParams(
            dimension_semantics=("parallel",),   # megacore sharding on v7x
            vmem_limit_bytes=vmem_limit,
        ),
        cost_estimate=cost,
    )


def mlp_concat_forward(x, attn, params, *, tm=None):
    """x, attn: (B, T, n_embd) float32.  params: dict of pre-transposed weights."""
    B, T, n_embd = x.shape
    assert attn.shape == (B, T, n_embd)
    hidden = MLP_SCALE * n_embd
    rows = B * T

    vmem_limit, tm_default = _select_budget()
    if tm is None:
        tm = tm_default
    # Row tile: multiple of 8 sublanes, capped at the problem size, and small
    # enough that the "parallel" row axis has >= 2 steps (v7x megacore).
    tm = min(tm, _round_up(rows, 8))
    tm = min(tm, max(8, _round_up(pl.cdiv(rows, 2), 8)))
    tm = max(tm, 8)
    n_tiles = pl.cdiv(rows, tm)     # ragged last tile handled by Pallas masking

    x2d = x.reshape(rows, n_embd).astype(jnp.float32)
    a2d = attn.reshape(rows, n_embd).astype(jnp.float32)

    gamma = params["gamma"].reshape(1, n_embd).astype(jnp.float32)
    beta = params["beta"].reshape(1, n_embd).astype(jnp.float32)
    w1 = params["w1"]                                   # (2*n_embd, hidden)
    w1x = w1[:n_embd].astype(jnp.bfloat16)              # (n_embd, hidden)
    w1a = w1[n_embd:].astype(jnp.bfloat16)              # (n_embd, hidden)
    b1 = params["b1"].reshape(1, hidden).astype(jnp.float32)
    w2 = params["w2"].astype(jnp.bfloat16)              # (hidden, n_embd)

    cost = pl.CostEstimate(
        flops=2 * rows * (2 * n_embd) * hidden + 2 * rows * hidden * n_embd,
        transcendentals=rows * hidden,
        bytes_accessed=(4 * (3 * rows * n_embd)                 # x, attn, out (f32)
                        + 2 * (2 * n_embd * hidden + hidden * n_embd)  # bf16 weights
                        + 4 * (2 * n_embd + hidden)),            # gamma, beta, b1
    )

    args = (x2d, a2d, gamma, beta, w1x, w1a, b1, w2)
    try:
        out2d = _build_call(tm, n_embd, hidden, rows, n_tiles, vmem_limit, cost,
                            single_buffer_weights=True)(*args)
    except Exception:
        # Fallback for toolchains without BlockSpec pipeline_mode support.
        out2d = _build_call(tm, n_embd, hidden, rows, n_tiles, vmem_limit, cost,
                            single_buffer_weights=False)(*args)

    return out2d.reshape(B, T, n_embd)


def init_params(key, n_embd):
    """Deterministic synthetic weights matching the torch module's shapes.

    torch c_fc:   weight (4n, 2n), bias (4n,)   -> stored transposed as (2n, 4n)
    torch c_proj: weight (n, 4n), no bias       -> stored transposed as (4n, n)
    torch ln:     gamma (n,), beta (n,)
    """
    hidden = MLP_SCALE * n_embd
    k1, k2, k3, k4, k5 = jax.random.split(key, 5)

    s1 = 1.0 / jnp.sqrt(2.0 * n_embd)
    s2 = 1.0 / jnp.sqrt(float(hidden))

    w1 = jax.random.uniform(k1, (2 * n_embd, hidden), jnp.float32, -s1, s1)
    b1 = jax.random.uniform(k2, (hidden,), jnp.float32, -s1, s1)
    w2 = jax.random.uniform(k3, (hidden, n_embd), jnp.float32, -s2, s2)
    # Perturb gamma/beta away from (1, 0) so the affine path is actually tested.
    gamma = 1.0 + 0.1 * jax.random.normal(k4, (n_embd,), jnp.float32)
    beta = 0.1 * jax.random.normal(k5, (n_embd,), jnp.float32)

    return {"w1": w1, "b1": b1, "w2": w2, "gamma": gamma, "beta": beta}


def _reference(x, attn, params):
    """Pure-JAX f32 reference mirroring the PyTorch forward."""
    mean = x.mean(-1, keepdims=True)
    var = ((x - mean) ** 2).mean(-1, keepdims=True)
    xn = (x - mean) / jnp.sqrt(var + LN_EPS)
    xn = xn * params["gamma"] + params["beta"]
    z = jnp.concatenate([xn, attn], axis=-1)
    h = z @ params["w1"] + params["b1"]
    g = 0.5 * h * (1.0 + jnp.tanh(_SQRT_2_OVER_PI * (h + 0.044715 * h ** 3)))
    return g @ params["w2"]


if __name__ == "__main__":
    B, T, N_EMBD = 2, 8, 64
    key = jax.random.PRNGKey(0)
    kx, ka, kp = jax.random.split(key, 3)

    x = jax.random.normal(kx, (B, T, N_EMBD), dtype=jnp.float32)
    attn = jax.random.normal(ka, (B, T, N_EMBD), dtype=jnp.float32)
    params = init_params(kp, N_EMBD)

    out = mlp_concat_forward(x, attn, params)
    jax.block_until_ready(out)

    ref = _reference(x, attn, params)
    assert out.shape == (B, T, N_EMBD)
    max_err = float(jnp.max(jnp.abs(out - ref)))
    # bf16 MXU operand path: ~1e-2 relative error vs the f32 reference.
    assert jnp.allclose(out, ref, atol=3e-2, rtol=3e-2), f"max_err={max_err}"

    print("KERNEL_OK")
</pallas_src>

<mosaic_0001>
module attributes {stable_mosaic.version = 11 : i64} {
  func.func @_mlp_concat_kernel(%arg0: i32, %arg1: memref<8x64xf32, #tpu.memory_space<vmem>>, %arg2: memref<8x64xf32, #tpu.memory_space<vmem>>, %arg3: memref<1x64xf32, #tpu.memory_space<vmem>>, %arg4: memref<1x64xf32, #tpu.memory_space<vmem>>, %arg5: memref<64x256xbf16, #tpu.memory_space<vmem>>, %arg6: memref<64x256xbf16, #tpu.memory_space<vmem>>, %arg7: memref<1x256xf32, #tpu.memory_space<vmem>>, %arg8: memref<256x64xbf16, #tpu.memory_space<vmem>>, %arg9: memref<8x64xf32, #tpu.memory_space<vmem>>) attributes {dimension_semantics = [#tpu.dimension_semantics<parallel>], iteration_bounds = array<i64: 2>, scalar_prefetch = 0 : i64, scratch_operands = 0 : i64, tpu.core_type = #tpu.core_type<tc>, window_params = [{transform_indices = @transform_0, window_bounds = array<i64: 8, 64>}, {transform_indices = @transform_1, window_bounds = array<i64: 8, 64>}, {pipeline_mode = #tpu.pipeline_mode<synchronous>, transform_indices = @transform_2, window_bounds = array<i64: 1, 64>}, {pipeline_mode = #tpu.pipeline_mode<synchronous>, transform_indices = @transform_3, window_bounds = array<i64: 1, 64>}, {pipeline_mode = #tpu.pipeline_mode<synchronous>, transform_indices = @transform_4, window_bounds = array<i64: 64, 256>}, {pipeline_mode = #tpu.pipeline_mode<synchronous>, transform_indices = @transform_5, window_bounds = array<i64: 64, 256>}, {pipeline_mode = #tpu.pipeline_mode<synchronous>, transform_indices = @transform_6, window_bounds = array<i64: 1, 256>}, {pipeline_mode = #tpu.pipeline_mode<synchronous>, transform_indices = @transform_7, window_bounds = array<i64: 256, 64>}, {transform_indices = @transform_8, window_bounds = array<i64: 8, 64>}]} {
    %c0 = arith.constant 0 : index
    %c0_0 = arith.constant 0 : index
    %0 = vector.load %arg1[%c0, %c0_0] : memref<8x64xf32, #tpu.memory_space<vmem>>, vector<8x64xf32>
    %cst = arith.constant dense<0.000000e+00> : vector<8xf32>
    %1 = vector.multi_reduction <add>, %0, %cst [1] : vector<8x64xf32> to vector<8xf32>
    %2 = vector.shape_cast %1 : vector<8xf32> to vector<8x1xf32>
    %cst_1 = arith.constant 6.400000e+01 : f32
    %3 = vector.broadcast %cst_1 : f32 to vector<8x1xf32>
    %4 = arith.divf %2, %3 : vector<8x1xf32>
    %5 = vector.broadcast %4 : vector<8x1xf32> to vector<8x64xf32>
    %6 = arith.subf %0, %5 : vector<8x64xf32>
    %7 = arith.mulf %6, %6 : vector<8x64xf32>
    %cst_2 = arith.constant dense<0.000000e+00> : vector<8xf32>
    %8 = vector.multi_reduction <add>, %7, %cst_2 [1] : vector<8x64xf32> to vector<8xf32>
    %9 = vector.shape_cast %8 : vector<8xf32> to vector<8x1xf32>
    %cst_3 = arith.constant 6.400000e+01 : f32
    %10 = vector.broadcast %cst_3 : f32 to vector<8x1xf32>
    %11 = arith.divf %9, %10 : vector<8x1xf32>
    %cst_4 = arith.constant 9.99999974E-6 : f32
    %12 = vector.broadcast %cst_4 : f32 to vector<8x1xf32>
    %13 = arith.addf %11, %12 : vector<8x1xf32>
    %14 = math.rsqrt %13 : vector<8x1xf32>
    %15 = vector.broadcast %14 : vector<8x1xf32> to vector<8x64xf32>
    %16 = arith.mulf %6, %15 : vector<8x64xf32>
    %c0_5 = arith.constant 0 : index
    %c0_6 = arith.constant 0 : index
    %17 = vector.load %arg3[%c0_5, %c0_6] : memref<1x64xf32, #tpu.memory_space<vmem>>, vector<1x64xf32>
    %18 = vector.broadcast %17 : vector<1x64xf32> to vector<8x64xf32>
    %19 = arith.mulf %16, %18 : vector<8x64xf32>
    %c0_7 = arith.constant 0 : index
    %c0_8 = arith.constant 0 : index
    %20 = vector.load %arg4[%c0_7, %c0_8] : memref<1x64xf32, #tpu.memory_space<vmem>>, vector<1x64xf32>
    %21 = vector.broadcast %20 : vector<1x64xf32> to vector<8x64xf32>
    %22 = arith.addf %19, %21 : vector<8x64xf32>
    %23 = arith.truncf %22 : vector<8x64xf32> to vector<8x64xbf16>
    %c0_9 = arith.constant 0 : index
    %c0_10 = arith.constant 0 : index
    %24 = vector.load %arg2[%c0_9, %c0_10] : memref<8x64xf32, #tpu.memory_space<vmem>>, vector<8x64xf32>
    %25 = arith.truncf %24 : vector<8x64xf32> to vector<8x64xbf16>
    %c0_11 = arith.constant 0 : index
    %c0_12 = arith.constant 0 : index
    %26 = vector.load %arg5[%c0_11, %c0_12] : memref<64x256xbf16, #tpu.memory_space<vmem>>, vector<64x256xbf16>
    %cst_13 = arith.constant dense<0.000000e+00> : vector<8x256xf32>
    %27 = tpu.matmul %23, %26, %cst_13 {dimension_numbers = #tpu.dot_dimension_numbers<[1], [0], [0], [1], [0, 0, 1, 1], [], []>} : vector<8x64xbf16>, vector<64x256xbf16>, vector<8x256xf32> -> vector<8x256xf32>
    %c0_14 = arith.constant 0 : index
    %c0_15 = arith.constant 0 : index
    %28 = vector.load %arg6[%c0_14, %c0_15] : memref<64x256xbf16, #tpu.memory_space<vmem>>, vector<64x256xbf16>
    %cst_16 = arith.constant dense<0.000000e+00> : vector<8x256xf32>
    %29 = tpu.matmul %25, %28, %cst_16 {dimension_numbers = #tpu.dot_dimension_numbers<[1], [0], [0], [1], [0, 0, 1, 1], [], []>} : vector<8x64xbf16>, vector<64x256xbf16>, vector<8x256xf32> -> vector<8x256xf32>
    %30 = arith.addf %27, %29 : vector<8x256xf32>
    %c0_17 = arith.constant 0 : index
    %c0_18 = arith.constant 0 : index
    %31 = vector.load %arg7[%c0_17, %c0_18] : memref<1x256xf32, #tpu.memory_space<vmem>>, vector<1x256xf32>
    %32 = vector.broadcast %31 : vector<1x256xf32> to vector<8x256xf32>
    %33 = arith.addf %30, %32 : vector<8x256xf32>
    %cst_19 = arith.constant 5.000000e-01 : f32
    %34 = vector.broadcast %cst_19 : f32 to vector<8x256xf32>
    %35 = arith.mulf %34, %33 : vector<8x256xf32>
    %cst_20 = arith.constant 0.797884583 : f32
    %36 = vector.broadcast %cst_20 : f32 to vector<8x256xf32>
    %37 = arith.mulf %36, %33 : vector<8x256xf32>
    %cst_21 = arith.constant 4.471500e-02 : f32
    %38 = vector.broadcast %cst_21 : f32 to vector<8x256xf32>
    %39 = arith.mulf %38, %33 : vector<8x256xf32>
    %40 = arith.mulf %39, %33 : vector<8x256xf32>
    %cst_22 = arith.constant 1.000000e+00 : f32
    %41 = vector.broadcast %cst_22 : f32 to vector<8x256xf32>
    %42 = arith.addf %41, %40 : vector<8x256xf32>
    %43 = arith.mulf %37, %42 : vector<8x256xf32>
    %44 = math.tanh %43 : vector<8x256xf32>
    %cst_23 = arith.constant 1.000000e+00 : f32
    %45 = vector.broadcast %cst_23 : f32 to vector<8x256xf32>
    %46 = arith.addf %45, %44 : vector<8x256xf32>
    %47 = arith.mulf %35, %46 : vector<8x256xf32>
    %48 = arith.truncf %47 : vector<8x256xf32> to vector<8x256xbf16>
    %c0_24 = arith.constant 0 : index
    %c0_25 = arith.constant 0 : index
    %49 = vector.load %arg8[%c0_24, %c0_25] : memref<256x64xbf16, #tpu.memory_space<vmem>>, vector<256x64xbf16>
    %cst_26 = arith.constant dense<0.000000e+00> : vector<8x64xf32>
    %50 = tpu.matmul %48, %49, %cst_26 {dimension_numbers = #tpu.dot_dimension_numbers<[1], [0], [0], [1], [0, 0, 1, 1], [], []>} : vector<8x256xbf16>, vector<256x64xbf16>, vector<8x64xf32> -> vector<8x64xf32>
    %c0_27 = arith.constant 0 : index
    %c0_28 = arith.constant 0 : index
    %51 = vector.load %arg9[%c0_27, %c0_28] : memref<8x64xf32, #tpu.memory_space<vmem>>, vector<8x64xf32>
    tpu.vector_store %arg9[%c0_27, %c0_28], %50 {strides = array<i32>} : memref<8x64xf32, #tpu.memory_space<vmem>>, vector<8x64xf32>,
    return
  }
  func.func @transform_0(%arg0: i32) -> (i32, i32) {
    %c0_i32 = arith.constant 0 : i32
    %c0_i32_0 = arith.constant 0 : i32
    return %arg0, %c0_i32 : i32, i32
  }
  func.func @transform_1(%arg0: i32) -> (i32, i32) {
    %c0_i32 = arith.constant 0 : i32
    %c0_i32_0 = arith.constant 0 : i32
    return %arg0, %c0_i32 : i32, i32
  }
  func.func @transform_2(%arg0: i32) -> (i32, i32) {
    %c0_i32 = arith.constant 0 : i32
    %c0_i32_0 = arith.constant 0 : i32
    %c0_i32_1 = arith.constant 0 : i32
    return %c0_i32, %c0_i32_0 : i32, i32
  }
  func.func @transform_3(%arg0: i32) -> (i32, i32) {
    %c0_i32 = arith.constant 0 : i32
    %c0_i32_0 = arith.constant 0 : i32
    %c0_i32_1 = arith.constant 0 : i32
    return %c0_i32, %c0_i32_0 : i32, i32
  }
  func.func @transform_4(%arg0: i32) -> (i32, i32) {
    %c0_i32 = arith.constant 0 : i32
    %c0_i32_0 = arith.constant 0 : i32
    %c0_i32_1 = arith.constant 0 : i32
    return %c0_i32, %c0_i32_0 : i32, i32
  }
  func.func @transform_5(%arg0: i32) -> (i32, i32) {
    %c0_i32 = arith.constant 0 : i32
    %c0_i32_0 = arith.constant 0 : i32
    %c0_i32_1 = arith.constant 0 : i32
    return %c0_i32, %c0_i32_0 : i32, i32
  }
  func.func @transform_6(%arg0: i32) -> (i32, i32) {
    %c0_i32 = arith.constant 0 : i32
    %c0_i32_0 = arith.constant 0 : i32
    %c0_i32_1 = arith.constant 0 : i32
    return %c0_i32, %c0_i32_0 : i32, i32
  }
  func.func @transform_7(%arg0: i32) -> (i32, i32) {
    %c0_i32 = arith.constant 0 : i32
    %c0_i32_0 = arith.constant 0 : i32
    %c0_i32_1 = arith.constant 0 : i32
    return %c0_i32, %c0_i32_0 : i32, i32
  }
  func.func @transform_8(%arg0: i32) -> (i32, i32) {
    %c0_i32 = arith.constant 0 : i32
    %c0_i32_0 = arith.constant 0 : i32
    return %arg0, %c0_i32 : i32, i32
  }
}

module attributes {stable_mosaic.version = 11 : i64} {
  func.func @_mlp_concat_kernel(%arg0: i32, %arg1: memref<8x64xf32, #tpu.memory_space<vmem>>, %arg2: memref<8x64xf32, #tpu.memory_space<vmem>>, %arg3: memref<1x64xf32, #tpu.memory_space<vmem>>, %arg4: memref<1x64xf32, #tpu.memory_space<vmem>>, %arg5: memref<64x256xbf16, #tpu.memory_space<vmem>>, %arg6: memref<64x256xbf16, #tpu.memory_space<vmem>>, %arg7: memref<1x256xf32, #tpu.memory_space<vmem>>, %arg8: memref<256x64xbf16, #tpu.memory_space<vmem>>, %arg9: memref<8x64xf32, #tpu.memory_space<vmem>>) attributes {dimension_semantics = [#tpu.dimension_semantics<parallel>], iteration_bounds = array<i64: 2>, scalar_prefetch = 0 : i64, scratch_operands = 0 : i64, tpu.core_type = #tpu.core_type<tc>, window_params = [{transform_indices = @transform_0, window_bounds = array<i64: 8, 64>}, {transform_indices = @transform_1, window_bounds = array<i64: 8, 64>}, {pipeline_mode = #tpu.pipeline_mode<synchronous>, transform_indices = @transform_2, window_bounds = array<i64: 1, 64>}, {pipeline_mode = #tpu.pipeline_mode<synchronous>, transform_indices = @transform_3, window_bounds = array<i64: 1, 64>}, {pipeline_mode = #tpu.pipeline_mode<synchronous>, transform_indices = @transform_4, window_bounds = array<i64: 64, 256>}, {pipeline_mode = #tpu.pipeline_mode<synchronous>, transform_indices = @transform_5, window_bounds = array<i64: 64, 256>}, {pipeline_mode = #tpu.pipeline_mode<synchronous>, transform_indices = @transform_6, window_bounds = array<i64: 1, 256>}, {pipeline_mode = #tpu.pipeline_mode<synchronous>, transform_indices = @transform_7, window_bounds = array<i64: 256, 64>}, {transform_indices = @transform_8, window_bounds = array<i64: 8, 64>}]} {
    %c0 = arith.constant 0 : index
    %c0_0 = arith.constant 0 : index
    %0 = vector.load %arg1[%c0, %c0_0] : memref<8x64xf32, #tpu.memory_space<vmem>>, vector<8x64xf32>
    %cst = arith.constant dense<0.000000e+00> : vector<8xf32>
    %1 = vector.multi_reduction <add>, %0, %cst [1] : vector<8x64xf32> to vector<8xf32>
    %2 = vector.shape_cast %1 : vector<8xf32> to vector<8x1xf32>
    %cst_1 = arith.constant 6.400000e+01 : f32
    %3 = vector.broadcast %cst_1 : f32 to vector<8x1xf32>
    %4 = arith.divf %2, %3 : vector<8x1xf32>
    %5 = vector.broadcast %4 : vector<8x1xf32> to vector<8x64xf32>
    %6 = arith.subf %0, %5 : vector<8x64xf32>
    %7 = arith.mulf %6, %6 : vector<8x64xf32>
    %cst_2 = arith.constant dense<0.000000e+00> : vector<8xf32>
    %8 = vector.multi_reduction <add>, %7, %cst_2 [1] : vector<8x64xf32> to vector<8xf32>
    %9 = vector.shape_cast %8 : vector<8xf32> to vector<8x1xf32>
    %cst_3 = arith.constant 6.400000e+01 : f32
    %10 = vector.broadcast %cst_3 : f32 to vector<8x1xf32>
    %11 = arith.divf %9, %10 : vector<8x1xf32>
    %cst_4 = arith.constant 9.99999974E-6 : f32
    %12 = vector.broadcast %cst_4 : f32 to vector<8x1xf32>
    %13 = arith.addf %11, %12 : vector<8x1xf32>
    %14 = math.rsqrt %13 : vector<8x1xf32>
    %15 = vector.broadcast %14 : vector<8x1xf32> to vector<8x64xf32>
    %16 = arith.mulf %6, %15 : vector<8x64xf32>
    %c0_5 = arith.constant 0 : index
    %c0_6 = arith.constant 0 : index
    %17 = vector.load %arg3[%c0_5, %c0_6] : memref<1x64xf32, #tpu.memory_space<vmem>>, vector<1x64xf32>
    %18 = vector.broadcast %17 : vector<1x64xf32> to vector<8x64xf32>
    %19 = arith.mulf %16, %18 : vector<8x64xf32>
    %c0_7 = arith.constant 0 : index
    %c0_8 = arith.constant 0 : index
    %20 = vector.load %arg4[%c0_7, %c0_8] : memref<1x64xf32, #tpu.memory_space<vmem>>, vector<1x64xf32>
    %21 = vector.broadcast %20 : vector<1x64xf32> to vector<8x64xf32>
    %22 = arith.addf %19, %21 : vector<8x64xf32>
    %23 = arith.truncf %22 : vector<8x64xf32> to vector<8x64xbf16>
    %c0_9 = arith.constant 0 : index
    %c0_10 = arith.constant 0 : index
    %24 = vector.load %arg2[%c0_9, %c0_10] : memref<8x64xf32, #tpu.memory_space<vmem>>, vector<8x64xf32>
    %25 = arith.truncf %24 : vector<8x64xf32> to vector<8x64xbf16>
    %c0_11 = arith.constant 0 : index
    %c0_12 = arith.constant 0 : index
    %26 = vector.load %arg5[%c0_11, %c0_12] : memref<64x256xbf16, #tpu.memory_space<vmem>>, vector<64x256xbf16>
    %cst_13 = arith.constant dense<0.000000e+00> : vector<8x256xf32>
    %27 = tpu.matmul %23, %26, %cst_13 {dimension_numbers = #tpu.dot_dimension_numbers<[1], [0], [0], [1], [0, 0, 1, 1], [], []>} : vector<8x64xbf16>, vector<64x256xbf16>, vector<8x256xf32> -> vector<8x256xf32>
    %c0_14 = arith.constant 0 : index
    %c0_15 = arith.constant 0 : index
    %28 = vector.load %arg6[%c0_14, %c0_15] : memref<64x256xbf16, #tpu.memory_space<vmem>>, vector<64x256xbf16>
    %cst_16 = arith.constant dense<0.000000e+00> : vector<8x256xf32>
    %29 = tpu.matmul %25, %28, %cst_16 {dimension_numbers = #tpu.dot_dimension_numbers<[1], [0], [0], [1], [0, 0, 1, 1], [], []>} : vector<8x64xbf16>, vector<64x256xbf16>, vector<8x256xf32> -> vector<8x256xf32>
    %30 = arith.addf %27, %29 : vector<8x256xf32>
    %c0_17 = arith.constant 0 : index
    %c0_18 = arith.constant 0 : index
    %31 = vector.load %arg7[%c0_17, %c0_18] : memref<1x256xf32, #tpu.memory_space<vmem>>, vector<1x256xf32>
    %32 = vector.broadcast %31 : vector<1x256xf32> to vector<8x256xf32>
    %33 = arith.addf %30, %32 : vector<8x256xf32>
    %cst_19 = arith.constant 5.000000e-01 : f32
    %34 = vector.broadcast %cst_19 : f32 to vector<8x256xf32>
    %35 = arith.mulf %34, %33 : vector<8x256xf32>
    %cst_20 = arith.constant 0.797884583 : f32
    %36 = vector.broadcast %cst_20 : f32 to vector<8x256xf32>
    %37 = arith.mulf %36, %33 : vector<8x256xf32>
    %cst_21 = arith.constant 4.471500e-02 : f32
    %38 = vector.broadcast %cst_21 : f32 to vector<8x256xf32>
    %39 = arith.mulf %38, %33 : vector<8x256xf32>
    %40 = arith.mulf %39, %33 : vector<8x256xf32>
    %cst_22 = arith.constant 1.000000e+00 : f32
    %41 = vector.broadcast %cst_22 : f32 to vector<8x256xf32>
    %42 = arith.addf %41, %40 : vector<8x256xf32>
    %43 = arith.mulf %37, %42 : vector<8x256xf32>
    %44 = math.tanh %43 : vector<8x256xf32>
    %cst_23 = arith.constant 1.000000e+00 : f32
    %45 = vector.broadcast %cst_23 : f32 to vector<8x256xf32>
    %46 = arith.addf %45, %44 : vector<8x256xf32>
    %47 = arith.mulf %35, %46 : vector<8x256xf32>
    %48 = arith.truncf %47 : vector<8x256xf32> to vector<8x256xbf16>
    %c0_24 = arith.constant 0 : index
    %c0_25 = arith.constant 0 : index
    %49 = vector.load %arg8[%c0_24, %c0_25] : memref<256x64xbf16, #tpu.memory_space<vmem>>, vector<256x64xbf16>
    %cst_26 = arith.constant dense<0.000000e+00> : vector<8x64xf32>
    %50 = tpu.matmul %48, %49, %cst_26 {dimension_numbers = #tpu.dot_dimension_numbers<[1], [0], [0], [1], [0, 0, 1, 1], [], []>} : vector<8x256xbf16>, vector<256x64xbf16>, vector<8x64xf32> -> vector<8x64xf32>
    %c0_27 = arith.constant 0 : index
    %c0_28 = arith.constant 0 : index
    %51 = vector.load %arg9[%c0_27, %c0_28] : memref<8x64xf32, #tpu.memory_space<vmem>>, vector<8x64xf32>
    tpu.vector_store %arg9[%c0_27, %c0_28], %50 {strides = array<i32>} : memref<8x64xf32, #tpu.memory_space<vmem>>, vector<8x64xf32>,
    return
  }
  func.func @transform_0(%arg0: i32) -> (i32, i32) {
    %c0_i32 = arith.constant 0 : i32
    %c0_i32_0 = arith.constant 0 : i32
    return %arg0, %c0_i32 : i32, i32
  }
  func.func @transform_1(%arg0: i32) -> (i32, i32) {
    %c0_i32 = arith.constant 0 : i32
    %c0_i32_0 = arith.constant 0 : i32
    return %arg0, %c0_i32 : i32, i32
  }
  func.func @transform_2(%arg0: i32) -> (i32, i32) {
    %c0_i32 = arith.constant 0 : i32
    %c0_i32_0 = arith.constant 0 : i32
    %c0_i32_1 = arith.constant 0 : i32
    return %c0_i32, %c0_i32_0 : i32, i32
  }
  func.func @transform_3(%arg0: i32) -> (i32, i32) {
    %c0_i32 = arith.constant 0 : i32
    %c0_i32_0 = arith.constant 0 : i32
    %c0_i32_1 = arith.constant 0 : i32
    return %c0_i32, %c0_i32_0 : i32, i32
  }
  func.func @transform_4(%arg0: i32) -> (i32, i32) {
    %c0_i32 = arith.constant 0 : i32
    %c0_i32_0 = arith.constant 0 : i32
    %c0_i32_1 = arith.constant 0 : i32
    return %c0_i32, %c0_i32_0 : i32, i32
  }
  func.func @transform_5(%arg0: i32) -> (i32, i32) {
    %c0_i32 = arith.constant 0 : i32
    %c0_i32_0 = arith.constant 0 : i32
    %c0_i32_1 = arith.constant 0 : i32
    return %c0_i32, %c0_i32_0 : i32, i32
  }
  func.func @transform_6(%arg0: i32) -> (i32, i32) {
    %c0_i32 = arith.constant 0 : i32
    %c0_i32_0 = arith.constant 0 : i32
    %c0_i32_1 = arith.constant 0 : i32
    return %c0_i32, %c0_i32_0 : i32, i32
  }
  func.func @transform_7(%arg0: i32) -> (i32, i32) {
    %c0_i32 = arith.constant 0 : i32
    %c0_i32_0 = arith.constant 0 : i32
    %c0_i32_1 = arith.constant 0 : i32
    return %c0_i32, %c0_i32_0 : i32, i32
  }
  func.func @transform_8(%arg0: i32) -> (i32, i32) {
    %c0_i32 = arith.constant 0 : i32
    %c0_i32_0 = arith.constant 0 : i32
    return %arg0, %c0_i32 : i32, i32
  }
}

</mosaic_0001>

<bundles_post_ra>
// kernel: tpu_custom_call.1
= control target key start
LH: loop header
LB: loop body
LE: loop exit
PB: predicated region body
PF: predicated region fallthrough
CT: control target
= control target key end

     0   :  { %13 = vsyncpa [#allocation3], 0  ;;  %s1305_s0 = inlined_call_operand.vmem [shape: f32[16,64], index: 0, kind: input, shape index: {}]   ;;  %s1306_s1 = inlined_call_operand.vmem [shape: f32[16,64], index: 1, kind: input, shape index: {}]   ;;  %s1307_s2 = inlined_call_operand.vmem [shape: f32[1,64], index: 2, kind: input, shape index: {}]   ;;  %s1308_s3 = inlined_call_operand.vmem [shape: f32[1,64], index: 3, kind: input, shape index: {}]   ;;  %s1309_s4 = inlined_call_operand.vmem [shape: bf16[64,256], index: 4, kind: input, shape index: {}]   ;;  %s1310_s5 = inlined_call_operand.vmem [shape: bf16[64,256], index: 5, kind: input, shape index: {}]   ;;  %s1311_s6 = inlined_call_operand.vmem [shape: f32[1,256], index: 6, kind: input, shape index: {}]   ;;  %s1312_s7 = inlined_call_operand.vmem [shape: bf16[256,64], index: 7, kind: input, shape index: {}]   ;;  %s1313_s8 = inlined_call_operand.hbm [shape: f32[16,64], index: 8, kind: output, shape index: {}]  }
   0x1   :  { %15 = vsyncpa [#allocation3 + $0x1], 0  ;;  %s1092_s27 = smov 0   ;;  %s1094_s28 = smov 0  }
   0x2   :  { %s1096_s29 = smov 0   ;;  %s1098_s30 = smov 0  }
   0x3 LB: > { %s1113_s9 = sadd.s32 4294967295, %s1043_s30   ;;  %s826_s10 = sadd.s32 4294967294, %s1043_s30   ;;  %s1043_s30 = sphi %s1098_s30, %s1319_s30   ;;  %s1039_s29 = sphi %s1096_s29, %s1318_s29   ;;  %s1035_s28 = sphi %s1094_s28, %s1317_s28   ;;  %s1031_s27 = sphi %s1092_s27, %s1316_s27  }
   0x4   : > { %s1117_s11 = sadd.s32 1, %s1043_s30   ;;  %s206_s12 = sadd.s32 1, %s1039_s29 }
   0x5   : > { %s203_s13 = ssub.s32 %s1043_s30, %s1117_s11  ;;  %p216_p0 = scmp.ne.s32.totalorder %s1039_s29, %s1035_s28 }
   0x6   : > { %p204_p1 = scmp.eq.s32.totalorder %s203_s13, 0  ;;  %p217_p2 = scmp.eq.s32.totalorder %s1113_s9, 1 }
   0x7   : > { %p222_p3 = scmp.ne.s32.totalorder %s1035_s28, %s1031_s27  ;;  %p223_p4 = scmp.eq.s32.totalorder %s826_s10, 1 }
   0x8   : > { %s1128_s14 = scalar_select %p204_p1, %s1039_s29, %s206_s12  }
   0x9   : > { %p1130_p5 = por %p217_p2, %p216_p0  ;;  %p1134_p6 = por %p223_p4, %p222_p3 }
   0xa   : > { %p829_p7 = scmp.ge.s32.totalorder %s1043_s30, 1  ;;  %p273_p8 = scmp.lt.s32.totalorder %s1043_s30, 3 }
   0xc   : > { %p274_p9 = pnand %p829_p7, %p273_p8 }
   0xd   : > { %p310_p10 = scmp.lt.s32.totalorder (!%p274_p9), %s1113_s9, 1  ;;  %vm320_vm0 = vcmask (!%p274_p9), 523264   ;;  %v935_v2 = vld [vmem:[%s1310_s5 + $0x4] ss:$8 sps:$4 sm:$0xff] (!%p274_p9)   ;;  %v937_v3 = vld [vmem:[%s1310_s5] ss:$8 sps:$4 sm:$0xff] (!%p274_p9)   ;;  %v540_v56 = vlaneseq (!%p274_p9) }
   0xe   : > { %277 = sbr.rel (%p274_p9) target bundleno = 813 (0x32d), region = 52  ;;  %v938_v4 = vld [vmem:[%s1310_s5 + $0x14] ss:$8 sps:$4 sm:$0xff] (!%p274_p9)   ;;  %413 = vmatprep.subr.bf16.mxu1 (!%p274_p9), %v935_v2  ;;  %v940_v5 = vld [vmem:[%s1310_s5 + $0x10] ss:$8 sps:$4 sm:$0xff] (!%p274_p9)   ;;  %v1045_v17 = vmov (!%p274_p9), 0  }
   0xf   : > { %414 = vmatpush1.bf16.msra.mxu1 (!%p274_p9), %v937_v3  ;;  %v941_v6 = vld [vmem:[%s1310_s5 + $0x24] ss:$8 sps:$4 sm:$0xff] (!%p274_p9)   ;;  %v943_v7 = vld [vmem:[%s1310_s5 + $0x20] ss:$8 sps:$4 sm:$0xff] (!%p274_p9)   ;;  %v944_v14 = vld [vmem:[%s1310_s5 + $0x34] ss:$8 sps:$4 sm:$0xff] (!%p274_p9)   ;;  %445 = vmatprep.mubr.bf16.mxu1 (!%p274_p9), %v1045_v17 }
  0x10   : > { %415 = vmatprep.subr.bf16.mxu1 (!%p274_p9), %v938_v4  ;;  %v946_v15 = vld [vmem:[%s1310_s5 + $0x30] ss:$8 sps:$4 sm:$0xff] (!%p274_p9)   ;;  %v949_v18 = vld [vmem:[%s1309_s4 + $0x4] ss:$8 sps:$4 sm:$0xff] (!%p274_p9)   ;;  %v947_v19 = vld [vmem:[%s1309_s4] ss:$8 sps:$4 sm:$0xff] (!%p274_p9)  }
  0x11   : > { %v952_v20 = vld [vmem:[%s1309_s4 + $0x14] ss:$8 sps:$4 sm:$0xff] (!%p274_p9)   ;;  %v950_v21 = vld [vmem:[%s1309_s4 + $0x10] ss:$8 sps:$4 sm:$0xff] (!%p274_p9)   ;;  %v955_v22 = vld [vmem:[%s1309_s4 + $0x24] ss:$8 sps:$4 sm:$0xff] (!%p274_p9)  }
  0x12   : > { %v953_v23 = vld [vmem:[%s1309_s4 + $0x20] ss:$8 sps:$4 sm:$0xff] (!%p274_p9)   ;;  %v956_v24 = vld [vmem:[%s1309_s4 + $0x30] ss:$8 sps:$4 sm:$0xff] (!%p274_p9)   ;;  %v958_v25 = vld [vmem:[%s1309_s4 + $0x34] ss:$8 sps:$4 sm:$0xff] (!%p274_p9)  }
  0x13   : > { %416 = vmatpush1.bf16.msra.mxu1 (!%p274_p9), %v940_v5  ;;  %v833_v30 = vld [vmem:[%s1307_s2] ss:$0 sm:$0xff] (!%p274_p9)  ;;  %v961_v42 = vld [vmem:[%s1312_s7 + $0x48] sm:$0xff] (!%p274_p9)   ;;  %v963_v44 = vld [vmem:[%s1312_s7 + $0x50] sm:$0xff] (!%p274_p9)   ;;  %v541_v57 = vshrl.u32 (!%p274_p9), %v540_v56, 7  ;;  %s870_s20 = sshll.u32 (!%p274_p9), %s1113_s9, 7 }
  0x14   : > { %417 = vmatprep.subr.bf16.mxu1 (!%p274_p9), %v941_v6  ;;  %v834_v32 = vld [vmem:[%s1308_s3] ss:$0 sm:$0xff] (!%p274_p9)  ;;  %v962_v43 = vld [vmem:[%s1312_s7 + $0x8] sm:$0xff] (!%p274_p9)   ;;  %v964_v45 = vld [vmem:[%s1312_s7 + $0x10] sm:$0xff] (!%p274_p9)   ;;  %s1262_s25 = scalar_lea.hbm (!%p274_p9), %s1313_s8, %s870_s20  ;;  %s1046_s10 = smov (!%p274_p9), [#allocation2]  }
  0x15   : > { %s311_s17 = scalar_select %p310_p10, %s1113_s9, 1  ;;  %v959_v40 = vld [vmem:[%s1312_s7 + $0x40] sm:$0xff]   ;;  %v965_v46 = vld [vmem:[%s1312_s7 + $0x58] sm:$0xff]   ;;  %v969_v50 = vld [vmem:[%s1312_s7 + $0x68] sm:$0xff]   ;;  %v542_v58 = vsub.s32 0, %v541_v57  ;;  %v546_v60 = vsub.s32 1, %v541_v57 }
  0x16   : > { %v960_v41 = vld [vmem:[%s1312_s7] sm:$0xff]   ;;  %873 = vmatprep.subr.bf16.mxu0 %v959_v40  ;;  %v966_v47 = vld [vmem:[%s1312_s7 + $0x18] sm:$0xff]   ;;  %v970_v51 = vld [vmem:[%s1312_s7 + $0x28] sm:$0xff]   ;;  %s985_s12 = sshll.u32 %s1046_s10, 4  ;;  %s986_s12 = int_to_ptr.vmem [resolvable:$false] %s985_s12 }
  0x17   : > { %s831_s18 = sshll.u32 %s311_s17, 3  ;;  %418 = vmatpush1.bf16.msra.mxu1 %v943_v7  ;;  %874 = vmatpush3.bf16.msra.mxu0 %v960_v41  ;;  %v967_v48 = vld [vmem:[%s1312_s7 + $0x60] sm:$0xff]   ;;  %v971_v52 = vld [vmem:[%s1312_s7 + $0x70] sm:$0xff]   ;;  %v973_v54 = vld [vmem:[%s1312_s7 + $0x78] sm:$0xff]   ;;  %s987_s13 = scalar_lea.vmem %s986_s12, 256 }
  0x18   : > { %s313_s21 = scalar_lea.vmem %s1305_s0, %s831_s18  ;;  %s317_s24 = scalar_lea.vmem %s1306_s1, %s831_s18  ;;  %419 = vmatprep.subr.bf16.mxu1 %v944_v14  ;;  %875 = vmatprep.subr.bf16.mxu0 %v961_v42  ;;  %v968_v49 = vld [vmem:[%s1312_s7 + $0x20] sm:$0xff]   ;;  %v972_v53 = vld [vmem:[%s1312_s7 + $0x30] sm:$0xff]   ;;  %v974_v55 = vld [vmem:[%s1312_s7 + $0x38] sm:$0xff]  }
  0x19   : > { %v319_v0 = vld [vmem:[%s313_s21] sm:$0xff]  ;;  %s307_s18 = sand.u32 1, %s1035_s28  }
  0x1a   : > { %v321_v1 = vsel %vm320_vm0, %v319_v0, 0.0  ;;  %v352_v13 = vld [vmem:[%s317_s24] sm:$0xff]  ;;  %s830_s19 = sshll.u32 %s307_s18, 3  ;;  %s742_s9 = scalar_lea.sflag [#allocation3], %s307_s18 }
  0x1b   : > { %322 = vadd.xlane.f32.xlu0 %v321_v1  ;;  %v353_v16 = vpack.c.bf16 %v352_v13, %v352_v13  ;;  %420 = vmatpush1.bf16.msra.mxu1 %v946_v15  ;;  %v538_v59 = vld [vmem:[%s1311_s6] sm:$0x3]  ;;  %s309_s21 = scalar_lea.vmem [#allocation2], %s830_s19 }
  0x1c   : > { %497 = vmatprep.subr.bf16.mxu1 %v949_v18  ;;  %876 = vmatpush3.bf16.msra.mxu0 %v962_v43  ;;  %v543_v61 = vrot.slane %v538_v59, %v542_v58  ;;  %v547_v63 = vrot.slane %v538_v59, %v546_v60  ;;  %s755_s22 = sshll.u32 %s309_s21, 4  ;;  %s1264_s22 = int_to_ptr.vmem [resolvable:$true] %s755_s22 }
  0x1d   : > { %877 = vmatprep.subr.bf16.mxu0 %v963_v44  ;;  %s981_s26 = scalar_lea.vmem %s1264_s22, 128  ;;  %p988_p0 = scmp.lt.s32.totalorder %s1264_s22, %s986_s12 }
  0x1e   : > { %843 = vmatmul.mubr.msk.bf16.vlgmr.msra.gmra.mrb[0].mxu1 %vm320_vm0, %v353_v16  ;;  %p982_p11 = scmp.ne.s32.totalorder %s1264_s22, %s981_s26  ;;  %p989_p1 = scmp.lt.s32.totalorder %s987_s13, %s981_s26 }
  0x1f   : > { %529 = vmatprep.mubr.bf16.mxu1 %v1045_v17  ;;  %498 = vmatpush1.bf16.msra.mxu1 %v947_v19 }
  0x20   : > { %499 = vmatprep.subr.bf16.mxu1 %v952_v20  ;;  %878 = vmatpush3.bf16.msra.mxu0 %v964_v45  ;;  %p983_p12 = pnand %p982_p11, %p1130_p5  ;;  %p990_p2 = por %p989_p1, %p988_p0 }
  0x21   : > { %879 = vmatprep.subr.bf16.mxu0 %v965_v46 }
  0x22   : > { %p984_p13 = pneg %p983_p12 }
  0x23   : > { %500 = vmatpush1.bf16.msra.mxu1 %v950_v21 }
  0x24   : > { %501 = vmatprep.subr.bf16.mxu1 %v955_v22  ;;  %880 = vmatpush3.bf16.msra.mxu0 %v966_v47  ;;  %p991_p3 = pnand %p990_p2, %p984_p13 }
  0x25   : > { %881 = vmatprep.subr.bf16.mxu0 %v967_v48 }
  0x27   : > { %502 = vmatpush1.bf16.msra.mxu1 %v953_v23 }
  0x28   : > { %503 = vmatprep.subr.bf16.mxu1 %v958_v25  ;;  %882 = vmatpush3.bf16.msra.mxu0 %v968_v49 }
  0x29   : > { %883 = vmatprep.subr.bf16.mxu0 %v969_v50 }
  0x2b   : > { %504 = vmatpush1.bf16.msra.mxu1 %v956_v24 }
  0x2c   : > { %884 = vmatpush3.bf16.msra.mxu0 %v970_v51 }
  0x2d   : > { %885 = vmatprep.subr.bf16.mxu0 %v971_v52 }
  0x30   : > { %886 = vmatpush3.bf16.msra.mxu0 %v972_v53 }
  0x31   : > { %887 = vmatprep.subr.bf16.mxu0 %v973_v54 }
  0x34   : > { %888 = vmatpush3.bf16.msra.mxu0 %v974_v55 }
  0xa8   : > { %v323_v8 = vpop.xlane.xlu0 %322 }
  0xa9   : > { %v325_v9 = vmul.f32 0.015625, %v323_v8 }
  0xab   : > { %v326_v10 = vsub.f32 %v319_v0, %v325_v9 }
  0xad   : > { %v327_v11 = vmul.f32 %v326_v10, %v326_v10 }
  0xaf   : > { %v328_v12 = vsel %vm320_vm0, %v327_v11, 0.0 }
  0xb0   : > { %329 = vadd.xlane.f32.xlu0 %v328_v12 }
  0xf1   : > { %v447_v36 = vpop.f32.mrb[0].mxu1 }
  0xf2   : > { %v449_v37 = vpop.f32.mrb[1].mxu1 }
  0xf3   : > { %v451_v38 = vpop.f32.mrb[2].mxu1 }
  0xf4   : > { %v452_v39 = vpop.f32.mrb[3].mxu1 }
 0x13d   : > { %v330_v26 = vpop.xlane.xlu0 %329 }
 0x13e   : > { %v331_v27 = vmul.f32 0.015625, %v330_v26 }
 0x140   : > { %v332_v28 = vadd.f32 1e-05, %v331_v27 }
 0x142   : > { %975 = vrsqrt.f32 %v332_v28 }
 0x14c   : > { %v976_v29 = vpop.eup %975 }
 0x14d   : > { %v334_v31 = vmul.f32 %v976_v29, %v326_v10 }
 0x14f   : > { %v342_v33 = vmul.f32 %v833_v30, %v334_v31 }
 0x151   : > { %v350_v34 = vadd.f32 %v834_v32, %v342_v33 }
 0x153   : > { %v351_v35 = vpack.c.bf16 %v350_v34, %v350_v34 }
 0x155   : > { %852 = vmatmul.mubr.msk.bf16.vlgmr.msra.gmra.mrb[4].mxu1 %vm320_vm0, %v351_v35 }
 0x228   : > { %v531_v62 = vpop.f32.mrb[4].mxu1 }
 0x229   : > { %v532_v0 = vadd.f32 %v531_v62, %v447_v36  ;;  %v533_v1 = vpop.f32.mrb[5].mxu1 }
 0x22a   : > { %v534_v2 = vadd.f32 %v533_v1, %v449_v37  ;;  %v535_v3 = vpop.f32.mrb[6].mxu1 }
 0x22b   : > { %v550_v4 = vadd.f32 %v543_v61, %v532_v0  ;;  %v536_v5 = vpop.f32.mrb[7].mxu1 }
 0x22c   : > { %v551_v6 = vadd.f32 %v547_v63, %v534_v2 }
 0x22d   : > { %v556_v7 = vmul.f32 0.044715, %v550_v4  ;;  %v554_v11 = vmul.f32 0.7978846, %v550_v4  ;;  %v552_v19 = vmul.f32 0.5, %v550_v4 }
 0x22e   : > { %v557_v8 = vmul.f32 0.044715, %v551_v6  ;;  %v555_v13 = vmul.f32 0.7978846, %v551_v6  ;;  %v553_v21 = vmul.f32 0.5, %v551_v6 }
 0x22f   : > { %v558_v9 = vmul.f32 %v556_v7, %v550_v4 }
 0x230   : > { %v559_v10 = vmul.f32 %v557_v8, %v551_v6 }
 0x231   : > { %v560_v12 = vadd.f32 1.0, %v558_v9 }
 0x232   : > { %v561_v14 = vadd.f32 1.0, %v559_v10 }
 0x233   : > { %v562_v15 = vmul.f32 %v560_v12, %v554_v11 }
 0x234   : > { %v563_v16 = vmul.f32 %v561_v14, %v555_v13 }
 0x235   : > { %977 = vtanh.f32 %v562_v15 }
 0x236   : > { %979 = vtanh.f32 %v563_v16 }
 0x23f   : > { %v978_v17 = vpop.eup %977 }
 0x240   : > { %v980_v18 = vpop.eup %979  ;;  %v566_v20 = vadd.f32 1.0, %v978_v17 }
 0x241   : > { %v567_v22 = vadd.f32 1.0, %v980_v18 }
 0x242   : > { %v568_v23 = vmul.f32 %v566_v20, %v552_v19 }
 0x243   : > { %v569_v24 = vmul.f32 %v567_v22, %v553_v21 }
 0x244   : > { %v570_v26 = vpack.c.bf16 %v568_v23, %v568_v23 }
 0x245   : > { %v571_v25 = vpack.c.bf16 %v569_v24, %v569_v24 }
 0x247   : > { %732 = vmatprep.mubr.bf16.mxu0 %v571_v25 }
 0x248   : > { %733 = vmatmul.mubr.bf16.vlgmr.msra.gmra.mrb[0].mxu0 %v570_v26 }
 0x31b   : > { %v889_v27 = vpop.f32.mrb[0].mxu0 }
 0x31c   : > { %v890_v28 = vpop.f32.mrb[1].mxu0 }
 0x31d   : > { %v891_v29 = vadd.f32 %v890_v28, %v889_v27  ;;  %v892_v30 = vpop.f32.mrb[2].mxu0 }
 0x31e   : > { %v893_v31 = vpop.f32.mrb[3].mxu0 }
 0x31f   : > { %740 = vst.msk [vmem:[%s309_s21] sm:$0xff] %vm320_vm0, %v891_v29 }
 0x320   : > { %994 = shalt.err (!%p991_p3)
}
 0x321   : > { %s995_s17 = scalar_lea.hbm %s1262_s25, 128  ;;  %s999_s20 = scalar_lea.hbm %s1313_s8, 256 }
 0x322   : > { %p996_p4 = scmp.ne.s32.totalorder %s1262_s25, %s995_s17  ;;  %p1000_p9 = scmp.lt.u32.totalorder %s1262_s25, %s1313_s8 }
 0x323   : > { %p1001_p10 = scmp.lt.u32.totalorder %s999_s20, %s995_s17  ;;  %p1003_p12 = scmp.lt.u32.totalorder %s995_s17, %s1262_s25 }
 0x324   : > { %p997_p7 = pnand %p996_p4, %p1130_p5 }
 0x325   : > { %p1002_p11 = por %p1001_p10, %p1000_p9 }
 0x326   : > { %p998_p8 = pneg %p997_p7 }
 0x327   : > { %p1004_p13 = por %p1003_p12, %p1002_p11 }
 0x329   : > { %p1005_p0 = pnand %p1004_p13, %p998_p8 }
 0x32b   : > { %1008 = shalt.err (!%p1005_p0)
}
 0x32c   : > { %895 = dma.vmem_to_hbm [thread:$0]  (%p1130_p5), %s1264_s22, 128, %s1262_s25, %s742_s9  }
 0x32d PF: > { %p901_p1 = scmp.ge.s32.totalorder %s1043_s30, 2  ;;  %s767_s24 = sand.u32 1, %s1031_s27  }
 0x32e   : > { %s768_s26 = scalar_lea.sflag [#allocation3], %s767_s24 }
 0x32f   : > { %p898_p2 = pnand %p901_p1, %p1134_p6 }
 0x331   : > { %1026 = dma.done.wait (!%p898_p2), %s768_s26, 128  }
 0x332   : > { %1028 = vsyncadd (!%p898_p2), %s768_s26, 4294967168  ;;  %p18_p3 = scmp.ge.s32.totalorder %s1117_s11, 4   ;;  %s1316_s27 = smov %s1035_s28 }
 0x333   : > { %s1317_s28 = smov %s1039_s29  ;;  %s1318_s29 = smov %s1128_s14 }
 0x334   : > { %s1319_s30 = smov %s1117_s11  ;;  %20 = sbr.rel (!%p18_p3) target bundleno = 3 (0x3), region = 90 }
 0x33b   :  { %773 = vsyncpa [#allocation3], 1 }
 0x33c   :  { %775 = vsyncpa [#allocation3 + $0x1], 1 }

// kernel: tpu_custom_call.1
= control target key start
LH: loop header
LB: loop body
LE: loop exit
PB: predicated region body
PF: predicated region fallthrough
CT: control target
= control target key end

     0   :  { %13 = vsyncpa [#allocation3], 0  ;;  %s1305_s0 = inlined_call_operand.vmem [shape: f32[16,64], index: 0, kind: input, shape index: {}]   ;;  %s1306_s1 = inlined_call_operand.vmem [shape: f32[16,64], index: 1, kind: input, shape index: {}]   ;;  %s1307_s2 = inlined_call_operand.vmem [shape: f32[1,64], index: 2, kind: input, shape index: {}]   ;;  %s1308_s3 = inlined_call_operand.vmem [shape: f32[1,64], index: 3, kind: input, shape index: {}]   ;;  %s1309_s4 = inlined_call_operand.vmem [shape: bf16[64,256], index: 4, kind: input, shape index: {}]   ;;  %s1310_s5 = inlined_call_operand.vmem [shape: bf16[64,256], index: 5, kind: input, shape index: {}]   ;;  %s1311_s6 = inlined_call_operand.vmem [shape: f32[1,256], index: 6, kind: input, shape index: {}]   ;;  %s1312_s7 = inlined_call_operand.vmem [shape: bf16[256,64], index: 7, kind: input, shape index: {}]   ;;  %s1313_s8 = inlined_call_operand.hbm [shape: f32[16,64], index: 8, kind: output, shape index: {}]  }
   0x1   :  { %15 = vsyncpa [#allocation3 + $0x1], 0  ;;  %s1092_s27 = smov 0   ;;  %s1094_s28 = smov 0  }
   0x2   :  { %s1096_s29 = smov 0   ;;  %s1098_s30 = smov 0  }
   0x3 LB: > { %s1113_s9 = sadd.s32 4294967295, %s1043_s30   ;;  %s826_s10 = sadd.s32 4294967294, %s1043_s30   ;;  %s1043_s30 = sphi %s1098_s30, %s1319_s30   ;;  %s1039_s29 = sphi %s1096_s29, %s1318_s29   ;;  %s1035_s28 = sphi %s1094_s28, %s1317_s28   ;;  %s1031_s27 = sphi %s1092_s27, %s1316_s27  }
   0x4   : > { %s1117_s11 = sadd.s32 1, %s1043_s30   ;;  %s206_s12 = sadd.s32 1, %s1039_s29 }
   0x5   : > { %s203_s13 = ssub.s32 %s1043_s30, %s1117_s11  ;;  %p216_p0 = scmp.ne.s32.totalorder %s1039_s29, %s1035_s28 }
   0x6   : > { %p204_p1 = scmp.eq.s32.totalorder %s203_s13, 0  ;;  %p217_p2 = scmp.eq.s32.totalorder %s1113_s9, 1 }
   0x7   : > { %p222_p3 = scmp.ne.s32.totalorder %s1035_s28, %s1031_s27  ;;  %p223_p4 = scmp.eq.s32.totalorder %s826_s10, 1 }
   0x8   : > { %s1128_s14 = scalar_select %p204_p1, %s1039_s29, %s206_s12  }
   0x9   : > { %p1130_p5 = por %p217_p2, %p216_p0  ;;  %p1134_p6 = por %p223_p4, %p222_p3 }
   0xa   : > { %p829_p7 = scmp.ge.s32.totalorder %s1043_s30, 1  ;;  %p273_p8 = scmp.lt.s32.totalorder %s1043_s30, 3 }
   0xc   : > { %p274_p9 = pnand %p829_p7, %p273_p8 }
   0xd   : > { %p310_p10 = scmp.lt.s32.totalorder (!%p274_p9), %s1113_s9, 1  ;;  %vm320_vm0 = vcmask (!%p274_p9), 523264   ;;  %v935_v2 = vld [vmem:[%s1310_s5 + $0x4] ss:$8 sps:$4 sm:$0xff] (!%p274_p9)   ;;  %v937_v3 = vld [vmem:[%s1310_s5] ss:$8 sps:$4 sm:$0xff] (!%p274_p9)   ;;  %v540_v56 = vlaneseq (!%p274_p9) }
   0xe   : > { %277 = sbr.rel (%p274_p9) target bundleno = 813 (0x32d), region = 52  ;;  %v938_v4 = vld [vmem:[%s1310_s5 + $0x14] ss:$8 sps:$4 sm:$0xff] (!%p274_p9)   ;;  %413 = vmatprep.subr.bf16.mxu1 (!%p274_p9), %v935_v2  ;;  %v940_v5 = vld [vmem:[%s1310_s5 + $0x10] ss:$8 sps:$4 sm:$0xff] (!%p274_p9)   ;;  %v1045_v17 = vmov (!%p274_p9), 0  }
   0xf   : > { %414 = vmatpush1.bf16.msra.mxu1 (!%p274_p9), %v937_v3  ;;  %v941_v6 = vld [vmem:[%s1310_s5 + $0x24] ss:$8 sps:$4 sm:$0xff] (!%p274_p9)   ;;  %v943_v7 = vld [vmem:[%s1310_s5 + $0x20] ss:$8 sps:$4 sm:$0xff] (!%p274_p9)   ;;  %v944_v14 = vld [vmem:[%s1310_s5 + $0x34] ss:$8 sps:$4 sm:$0xff] (!%p274_p9)   ;;  %445 = vmatprep.mubr.bf16.mxu1 (!%p274_p9), %v1045_v17 }
  0x10   : > { %415 = vmatprep.subr.bf16.mxu1 (!%p274_p9), %v938_v4  ;;  %v946_v15 = vld [vmem:[%s1310_s5 + $0x30] ss:$8 sps:$4 sm:$0xff] (!%p274_p9)   ;;  %v949_v18 = vld [vmem:[%s1309_s4 + $0x4] ss:$8 sps:$4 sm:$0xff] (!%p274_p9)   ;;  %v947_v19 = vld [vmem:[%s1309_s4] ss:$8 sps:$4 sm:$0xff] (!%p274_p9)  }
  0x11   : > { %v952_v20 = vld [vmem:[%s1309_s4 + $0x14] ss:$8 sps:$4 sm:$0xff] (!%p274_p9)   ;;  %v950_v21 = vld [vmem:[%s1309_s4 + $0x10] ss:$8 sps:$4 sm:$0xff] (!%p274_p9)   ;;  %v955_v22 = vld [vmem:[%s1309_s4 + $0x24] ss:$8 sps:$4 sm:$0xff] (!%p274_p9)  }
  0x12   : > { %v953_v23 = vld [vmem:[%s1309_s4 + $0x20] ss:$8 sps:$4 sm:$0xff] (!%p274_p9)   ;;  %v956_v24 = vld [vmem:[%s1309_s4 + $0x30] ss:$8 sps:$4 sm:$0xff] (!%p274_p9)   ;;  %v958_v25 = vld [vmem:[%s1309_s4 + $0x34] ss:$8 sps:$4 sm:$0xff] (!%p274_p9)  }
  0x13   : > { %416 = vmatpush1.bf16.msra.mxu1 (!%p274_p9), %v940_v5  ;;  %v833_v30 = vld [vmem:[%s1307_s2] ss:$0 sm:$0xff] (!%p274_p9)  ;;  %v961_v42 = vld [vmem:[%s1312_s7 + $0x48] sm:$0xff] (!%p274_p9)   ;;  %v963_v44 = vld [vmem:[%s1312_s7 + $0x50] sm:$0xff] (!%p274_p9)   ;;  %v541_v57 = vshrl.u32 (!%p274_p9), %v540_v56, 7  ;;  %s870_s20 = sshll.u32 (!%p274_p9), %s1113_s9, 7 }
  0x14   : > { %417 = vmatprep.subr.bf16.mxu1 (!%p274_p9), %v941_v6  ;;  %v834_v32 = vld [vmem:[%s1308_s3] ss:$0 sm:$0xff] (!%p274_p9)  ;;  %v962_v43 = vld [vmem:[%s1312_s7 + $0x8] sm:$0xff] (!%p274_p9)   ;;  %v964_v45 = vld [vmem:[%s1312_s7 + $0x10] sm:$0xff] (!%p274_p9)   ;;  %s1262_s25 = scalar_lea.hbm (!%p274_p9), %s1313_s8, %s870_s20  ;;  %s1046_s10 = smov (!%p274_p9), [#allocation2]  }
  0x15   : > { %s311_s17 = scalar_select %p310_p10, %s1113_s9, 1  ;;  %v959_v40 = vld [vmem:[%s1312_s7 + $0x40] sm:$0xff]   ;;  %v965_v46 = vld [vmem:[%s1312_s7 + $0x58] sm:$0xff]   ;;  %v969_v50 = vld [vmem:[%s1312_s7 + $0x68] sm:$0xff]   ;;  %v542_v58 = vsub.s32 0, %v541_v57  ;;  %v546_v60 = vsub.s32 1, %v541_v57 }
  0x16   : > { %v960_v41 = vld [vmem:[%s1312_s7] sm:$0xff]   ;;  %873 = vmatprep.subr.bf16.mxu0 %v959_v40  ;;  %v966_v47 = vld [vmem:[%s1312_s7 + $0x18] sm:$0xff]   ;;  %v970_v51 = vld [vmem:[%s1312_s7 + $0x28] sm:$0xff]   ;;  %s985_s12 = sshll.u32 %s1046_s10, 4  ;;  %s986_s12 = int_to_ptr.vmem [resolvable:$false] %s985_s12 }
  0x17   : > { %s831_s18 = sshll.u32 %s311_s17, 3  ;;  %418 = vmatpush1.bf16.msra.mxu1 %v943_v7  ;;  %874 = vmatpush3.bf16.msra.mxu0 %v960_v41  ;;  %v967_v48 = vld [vmem:[%s1312_s7 + $0x60] sm:$0xff]   ;;  %v971_v52 = vld [vmem:[%s1312_s7 + $0x70] sm:$0xff]   ;;  %v973_v54 = vld [vmem:[%s1312_s7 + $0x78] sm:$0xff]   ;;  %s987_s13 = scalar_lea.vmem %s986_s12, 256 }
  0x18   : > { %s313_s21 = scalar_lea.vmem %s1305_s0, %s831_s18  ;;  %s317_s24 = scalar_lea.vmem %s1306_s1, %s831_s18  ;;  %419 = vmatprep.subr.bf16.mxu1 %v944_v14  ;;  %875 = vmatprep.subr.bf16.mxu0 %v961_v42  ;;  %v968_v49 = vld [vmem:[%s1312_s7 + $0x20] sm:$0xff]   ;;  %v972_v53 = vld [vmem:[%s1312_s7 + $0x30] sm:$0xff]   ;;  %v974_v55 = vld [vmem:[%s1312_s7 + $0x38] sm:$0xff]  }
  0x19   : > { %v319_v0 = vld [vmem:[%s313_s21] sm:$0xff]  ;;  %s307_s18 = sand.u32 1, %s1035_s28  }
  0x1a   : > { %v321_v1 = vsel %vm320_vm0, %v319_v0, 0.0  ;;  %v352_v13 = vld [vmem:[%s317_s24] sm:$0xff]  ;;  %s830_s19 = sshll.u32 %s307_s18, 3  ;;  %s742_s9 = scalar_lea.sflag [#allocation3], %s307_s18 }
  0x1b   : > { %322 = vadd.xlane.f32.xlu0 %v321_v1  ;;  %v353_v16 = vpack.c.bf16 %v352_v13, %v352_v13  ;;  %420 = vmatpush1.bf16.msra.mxu1 %v946_v15  ;;  %v538_v59 = vld [vmem:[%s1311_s6] sm:$0x3]  ;;  %s309_s21 = scalar_lea.vmem [#allocation2], %s830_s19 }
  0x1c   : > { %497 = vmatprep.subr.bf16.mxu1 %v949_v18  ;;  %876 = vmatpush3.bf16.msra.mxu0 %v962_v43  ;;  %v543_v61 = vrot.slane %v538_v59, %v542_v58  ;;  %v547_v63 = vrot.slane %v538_v59, %v546_v60  ;;  %s755_s22 = sshll.u32 %s309_s21, 4  ;;  %s1264_s22 = int_to_ptr.vmem [resolvable:$true] %s755_s22 }
  0x1d   : > { %877 = vmatprep.subr.bf16.mxu0 %v963_v44  ;;  %s981_s26 = scalar_lea.vmem %s1264_s22, 128  ;;  %p988_p0 = scmp.lt.s32.totalorder %s1264_s22, %s986_s12 }
  0x1e   : > { %843 = vmatmul.mubr.msk.bf16.vlgmr.msra.gmra.mrb[0].mxu1 %vm320_vm0, %v353_v16  ;;  %p982_p11 = scmp.ne.s32.totalorder %s1264_s22, %s981_s26  ;;  %p989_p1 = scmp.lt.s32.totalorder %s987_s13, %s981_s26 }
  0x1f   : > { %529 = vmatprep.mubr.bf16.mxu1 %v1045_v17  ;;  %498 = vmatpush1.bf16.msra.mxu1 %v947_v19 }
  0x20   : > { %499 = vmatprep.subr.bf16.mxu1 %v952_v20  ;;  %878 = vmatpush3.bf16.msra.mxu0 %v964_v45  ;;  %p983_p12 = pnand %p982_p11, %p1130_p5  ;;  %p990_p2 = por %p989_p1, %p988_p0 }
  0x21   : > { %879 = vmatprep.subr.bf16.mxu0 %v965_v46 }
  0x22   : > { %p984_p13 = pneg %p983_p12 }
  0x23   : > { %500 = vmatpush1.bf16.msra.mxu1 %v950_v21 }
  0x24   : > { %501 = vmatprep.subr.bf16.mxu1 %v955_v22  ;;  %880 = vmatpush3.bf16.msra.mxu0 %v966_v47  ;;  %p991_p3 = pnand %p990_p2, %p984_p13 }
  0x25   : > { %881 = vmatprep.subr.bf16.mxu0 %v967_v48 }
  0x27   : > { %502 = vmatpush1.bf16.msra.mxu1 %v953_v23 }
  0x28   : > { %503 = vmatprep.subr.bf16.mxu1 %v958_v25  ;;  %882 = vmatpush3.bf16.msra.mxu0 %v968_v49 }
  0x29   : > { %883 = vmatprep.subr.bf16.mxu0 %v969_v50 }
  0x2b   : > { %504 = vmatpush1.bf16.msra.mxu1 %v956_v24 }
  0x2c   : > { %884 = vmatpush3.bf16.msra.mxu0 %v970_v51 }
  0x2d   : > { %885 = vmatprep.subr.bf16.mxu0 %v971_v52 }
  0x30   : > { %886 = vmatpush3.bf16.msra.mxu0 %v972_v53 }
  0x31   : > { %887 = vmatprep.subr.bf16.mxu0 %v973_v54 }
  0x34   : > { %888 = vmatpush3.bf16.msra.mxu0 %v974_v55 }
  0xa8   : > { %v323_v8 = vpop.xlane.xlu0 %322 }
  0xa9   : > { %v325_v9 = vmul.f32 0.015625, %v323_v8 }
  0xab   : > { %v326_v10 = vsub.f32 %v319_v0, %v325_v9 }
  0xad   : > { %v327_v11 = vmul.f32 %v326_v10, %v326_v10 }
  0xaf   : > { %v328_v12 = vsel %vm320_vm0, %v327_v11, 0.0 }
  0xb0   : > { %329 = vadd.xlane.f32.xlu0 %v328_v12 }
  0xf1   : > { %v447_v36 = vpop.f32.mrb[0].mxu1 }
  0xf2   : > { %v449_v37 = vpop.f32.mrb[1].mxu1 }
  0xf3   : > { %v451_v38 = vpop.f32.mrb[2].mxu1 }
  0xf4   : > { %v452_v39 = vpop.f32.mrb[3].mxu1 }
 0x13d   : > { %v330_v26 = vpop.xlane.xlu0 %329 }
 0x13e   : > { %v331_v27 = vmul.f32 0.015625, %v330_v26 }
 0x140   : > { %v332_v28 = vadd.f32 1e-05, %v331_v27 }
 0x142   : > { %975 = vrsqrt.f32 %v332_v28 }
 0x14c   : > { %v976_v29 = vpop.eup %975 }
 0x14d   : > { %v334_v31 = vmul.f32 %v976_v29, %v326_v10 }
 0x14f   : > { %v342_v33 = vmul.f32 %v833_v30, %v334_v31 }
 0x151   : > { %v350_v34 = vadd.f32 %v834_v32, %v342_v33 }
 0x153   : > { %v351_v35 = vpack.c.bf16 %v350_v34, %v350_v34 }
 0x155   : > { %852 = vmatmul.mubr.msk.bf16.vlgmr.msra.gmra.mrb[4].mxu1 %vm320_vm0, %v351_v35 }
 0x228   : > { %v531_v62 = vpop.f32.mrb[4].mxu1 }
 0x229   : > { %v532_v0 = vadd.f32 %v531_v62, %v447_v36  ;;  %v533_v1 = vpop.f32.mrb[5].mxu1 }
 0x22a   : > { %v534_v2 = vadd.f32 %v533_v1, %v449_v37  ;;  %v535_v3 = vpop.f32.mrb[6].mxu1 }
 0x22b   : > { %v550_v4 = vadd.f32 %v543_v61, %v532_v0  ;;  %v536_v5 = vpop.f32.mrb[7].mxu1 }
 0x22c   : > { %v551_v6 = vadd.f32 %v547_v63, %v534_v2 }
 0x22d   : > { %v556_v7 = vmul.f32 0.044715, %v550_v4  ;;  %v554_v11 = vmul.f32 0.7978846, %v550_v4  ;;  %v552_v19 = vmul.f32 0.5, %v550_v4 }
 0x22e   : > { %v557_v8 = vmul.f32 0.044715, %v551_v6  ;;  %v555_v13 = vmul.f32 0.7978846, %v551_v6  ;;  %v553_v21 = vmul.f32 0.5, %v551_v6 }
 0x22f   : > { %v558_v9 = vmul.f32 %v556_v7, %v550_v4 }
 0x230   : > { %v559_v10 = vmul.f32 %v557_v8, %v551_v6 }
 0x231   : > { %v560_v12 = vadd.f32 1.0, %v558_v9 }
 0x232   : > { %v561_v14 = vadd.f32 1.0, %v559_v10 }
 0x233   : > { %v562_v15 = vmul.f32 %v560_v12, %v554_v11 }
 0x234   : > { %v563_v16 = vmul.f32 %v561_v14, %v555_v13 }
 0x235   : > { %977 = vtanh.f32 %v562_v15 }
 0x236   : > { %979 = vtanh.f32 %v563_v16 }
 0x23f   : > { %v978_v17 = vpop.eup %977 }
 0x240   : > { %v980_v18 = vpop.eup %979  ;;  %v566_v20 = vadd.f32 1.0, %v978_v17 }
 0x241   : > { %v567_v22 = vadd.f32 1.0, %v980_v18 }
 0x242   : > { %v568_v23 = vmul.f32 %v566_v20, %v552_v19 }
 0x243   : > { %v569_v24 = vmul.f32 %v567_v22, %v553_v21 }
 0x244   : > { %v570_v26 = vpack.c.bf16 %v568_v23, %v568_v23 }
 0x245   : > { %v571_v25 = vpack.c.bf16 %v569_v24, %v569_v24 }
 0x247   : > { %732 = vmatprep.mubr.bf16.mxu0 %v571_v25 }
 0x248   : > { %733 = vmatmul.mubr.bf16.vlgmr.msra.gmra.mrb[0].mxu0 %v570_v26 }
 0x31b   : > { %v889_v27 = vpop.f32.mrb[0].mxu0 }
 0x31c   : > { %v890_v28 = vpop.f32.mrb[1].mxu0 }
 0x31d   : > { %v891_v29 = vadd.f32 %v890_v28, %v889_v27  ;;  %v892_v30 = vpop.f32.mrb[2].mxu0 }
 0x31e   : > { %v893_v31 = vpop.f32.mrb[3].mxu0 }
 0x31f   : > { %740 = vst.msk [vmem:[%s309_s21] sm:$0xff] %vm320_vm0, %v891_v29 }
 0x320   : > { %994 = shalt.err (!%p991_p3)
}
 0x321   : > { %s995_s17 = scalar_lea.hbm %s1262_s25, 128  ;;  %s999_s20 = scalar_lea.hbm %s1313_s8, 256 }
 0x322   : > { %p996_p4 = scmp.ne.s32.totalorder %s1262_s25, %s995_s17  ;;  %p1000_p9 = scmp.lt.u32.totalorder %s1262_s25, %s1313_s8 }
 0x323   : > { %p1001_p10 = scmp.lt.u32.totalorder %s999_s20, %s995_s17  ;;  %p1003_p12 = scmp.lt.u32.totalorder %s995_s17, %s1262_s25 }
 0x324   : > { %p997_p7 = pnand %p996_p4, %p1130_p5 }
 0x325   : > { %p1002_p11 = por %p1001_p10, %p1000_p9 }
 0x326   : > { %p998_p8 = pneg %p997_p7 }
 0x327   : > { %p1004_p13 = por %p1003_p12, %p1002_p11 }
 0x329   : > { %p1005_p0 = pnand %p1004_p13, %p998_p8 }
 0x32b   : > { %1008 = shalt.err (!%p1005_p0)
}
 0x32c   : > { %895 = dma.vmem_to_hbm [thread:$0]  (%p1130_p5), %s1264_s22, 128, %s1262_s25, %s742_s9  }
 0x32d PF: > { %p901_p1 = scmp.ge.s32.totalorder %s1043_s30, 2  ;;  %s767_s24 = sand.u32 1, %s1031_s27  }
 0x32e   : > { %s768_s26 = scalar_lea.sflag [#allocation3], %s767_s24 }
 0x32f   : > { %p898_p2 = pnand %p901_p1, %p1134_p6 }
 0x331   : > { %1026 = dma.done.wait (!%p898_p2), %s768_s26, 128  }
 0x332   : > { %1028 = vsyncadd (!%p898_p2), %s768_s26, 4294967168  ;;  %p18_p3 = scmp.ge.s32.totalorder %s1117_s11, 4   ;;  %s1316_s27 = smov %s1035_s28 }
 0x333   : > { %s1317_s28 = smov %s1039_s29  ;;  %s1318_s29 = smov %s1128_s14 }
 0x334   : > { %s1319_s30 = smov %s1117_s11  ;;  %20 = sbr.rel (!%p18_p3) target bundleno = 3 (0x3), region = 90 }
 0x33b   :  { %773 = vsyncpa [#allocation3], 1 }
 0x33c   :  { %775 = vsyncpa [#allocation3 + $0x1], 1 }

</bundles_post_ra>
